<compile_context>
chip_gen: v7x
topology: tpu7x:2x2x1
jax: 0.10.0
libtpu: 0.0.40
codegen_flags: <defaults>
</compile_context>

<pallas_src>
import math
from typing import NamedTuple, Tuple

import numpy as np
import jax
import jax.numpy as jnp
from jax.experimental import pallas as pl
from jax.experimental.pallas import tpu as pltpu

LANE = 128             # TPU lane width — batch sits on the lane axis
H_PAD = 128            # hidden 64 -> 128 (lane aligned); 2 spare rows reused for bias folding
OUT_PAD = 8            # output rows padded to a sublane multiple (real rows = num_actions)
MAX_TILE = 1024        # max batch columns per grid step
MIN_PALLAS_BATCH = 64  # below this, plain XLA beats kernel-launch + padding overhead


def _round_up(x, m):
    return ((x + m - 1) // m) * m


# ---------------------------------------------------------------------------
# Kernel
# ---------------------------------------------------------------------------
def _actor_mlp_kernel(x_ref, w1_ref, w2_ref, w3_ref, o_ref):
    """One (features, TILE_B) feature-major tile of the Actor MLP + clamp.

    Biases are folded into the weights via reserved rows:
      * x row `num_inputs`   == 1                      -> w1t column carries b1
      * h1 row `hidden`      == ReLU(1)     == 1       -> w2t column carries b2
      * h2 row `hidden + 1`  == sigmoid(0)  == 0.5     -> w3t column carries 2*b3
    Matmuls run bf16 on the MXU with f32 accumulation; activations/clamp in f32.
    """
    x = x_ref[...]                                                      # (IN_PAD, T) bf16
    h1 = jnp.dot(w1_ref[...], x, preferred_element_type=jnp.float32)   # (H_PAD, T) f32
    h1 = jnp.maximum(h1, 0.0).astype(jnp.bfloat16)                     # VPU
    z2 = jnp.dot(w2_ref[...], h1, preferred_element_type=jnp.float32)  # (H_PAD, T) f32
    h2 = jax.nn.sigmoid(z2).astype(jnp.bfloat16)                       # EUP
    z3 = jnp.dot(w3_ref[...], h2, preferred_element_type=jnp.float32)  # (OUT_PAD, T) f32
    o_ref[...] = jnp.clip(z3, 0.001, 1.0)                              # lane-dense store


# ---------------------------------------------------------------------------
# Parameters
# ---------------------------------------------------------------------------
class ActorParams(NamedTuple):
    raw: Tuple[jnp.ndarray, ...]   # original f32 (w1,b1,w2,b2,w3,b3); w: (in,out), b: (out,)
    w1t: jnp.ndarray               # (H_PAD, IN_PAD) bf16, b1 folded in
    w2t: jnp.ndarray               # (H_PAD, H_PAD)  bf16, b2 folded in
    w3t: jnp.ndarray               # (OUT_PAD, H_PAD) bf16, 2*b3 folded in
    num_inputs: int
    num_actions: int
    hidden_size: int


def init_actor_params(key, num_inputs, num_actions, hidden_size=64):
    """PyTorch Linear default init: U(-1/sqrt(fan_in), 1/sqrt(fan_in))."""
    def linear(k, fan_in, fan_out):
        kw, kb = jax.random.split(k)
        bound = 1.0 / math.sqrt(fan_in)
        w = jax.random.uniform(kw, (fan_in, fan_out), jnp.float32, -bound, bound)
        b = jax.random.uniform(kb, (fan_out,), jnp.float32, -bound, bound)
        return w, b

    k1, k2, k3 = jax.random.split(key, 3)
    w1, b1 = linear(k1, num_inputs, hidden_size)
    w2, b2 = linear(k2, hidden_size, hidden_size)
    w3, b3 = linear(k3, hidden_size, num_actions)
    return (w1, b1, w2, b2, w3, b3)


def build_actor_params(raw, num_inputs, num_actions, hidden_size=64):
    """Pad/transpose to the kernel's feature-major bf16 layout with folded biases.

    Zero padding is exact: padded h1 rows are ReLU(0)=0; padded h2 rows are
    sigmoid(0)=0.5 but the matching w3t columns are zero; 0.5*(2*b3) == b3
    exactly in binary floating point.
    """
    w1, b1, w2, b2, w3, b3 = raw
    assert hidden_size + 2 <= H_PAD and num_actions <= OUT_PAD
    in_pad = _round_up(num_inputs + 1, 16)   # +1 ones row; 16 = bf16 sublane packing
    one_col = num_inputs                     # x row that is constant 1
    one_row = hidden_size                    # h1 row forced to 1   (carries b2)
    half_row = hidden_size + 1               # h2 row forced to 0.5 (carries b3)

    w1t = jnp.zeros((H_PAD, in_pad), jnp.float32)
    w1t = w1t.at[:hidden_size, :num_inputs].set(w1.T)
    w1t = w1t.at[:hidden_size, one_col].set(b1)
    w1t = w1t.at[one_row, one_col].set(1.0)            # -> h1[one_row] = ReLU(1) = 1

    w2t = jnp.zeros((H_PAD, H_PAD), jnp.float32)
    w2t = w2t.at[:hidden_size, :hidden_size].set(w2.T)
    w2t = w2t.at[:hidden_size, one_row].set(b2)
    # row half_row stays zero -> z2[half_row] = 0 -> h2[half_row] = sigmoid(0) = 0.5

    w3t = jnp.zeros((OUT_PAD, H_PAD), jnp.float32)
    w3t = w3t.at[:num_actions, :hidden_size].set(w3.T)
    w3t = w3t.at[:num_actions, half_row].set(2.0 * b3)  # 0.5 * (2*b3) == b3

    bf = lambda a: a.astype(jnp.bfloat16)
    return ActorParams(raw=raw, w1t=bf(w1t), w2t=bf(w2t), w3t=bf(w3t),
                       num_inputs=num_inputs, num_actions=num_actions,
                       hidden_size=hidden_size)


# ---------------------------------------------------------------------------
# Pallas wrapper
# ---------------------------------------------------------------------------
def _choose_tiling(batch):
    """Lane-aligned batch pad + tile.  Big tiles amortize per-step overhead, but keep
    >=2 grid steps once the batch allows it so v7x's 2 TCs both get work."""
    b_pad = max(LANE, _round_up(batch, LANE))
    if b_pad == LANE:
        return b_pad, LANE
    tile = min(MAX_TILE, _round_up(b_pad // 2, LANE))
    b_pad = _round_up(b_pad, tile)
    return b_pad, tile


def _actor_mlp_pallas(params: ActorParams, states):
    """states: (B, num_inputs) -> (OUT_PAD, b_pad) f32 clamped; columns >= B are pad."""
    B = states.shape[0]
    b_pad, tile = _choose_tiling(B)
    in_pad = params.w1t.shape[1]

    # Feature-major augmented input: features on sublanes, batch on lanes, ones row for b1.
    x_aug = jnp.concatenate(
        [states.astype(jnp.float32).T, jnp.ones((1, B), jnp.float32)], axis=0)
    x_aug = jnp.pad(x_aug, ((0, in_pad - params.num_inputs - 1), (0, b_pad - B)))
    x_aug = x_aug.astype(jnp.bfloat16)

    const = lambda i: (0, 0)   # weights: same block every step -> stay VMEM-resident
    out = pl.pallas_call(
        _actor_mlp_kernel,
        out_shape=jax.ShapeDtypeStruct((OUT_PAD, b_pad), jnp.float32),
        grid=(b_pad // tile,),
        in_specs=[
            pl.BlockSpec((in_pad, tile), lambda i: (0, i)),   # x tile (batch on lanes)
            pl.BlockSpec(params.w1t.shape, const),            # (H_PAD, IN_PAD)
            pl.BlockSpec(params.w2t.shape, const),            # (H_PAD, H_PAD)
            pl.BlockSpec(params.w3t.shape, const),            # (OUT_PAD, H_PAD)
        ],
        out_specs=pl.BlockSpec((OUT_PAD, tile), lambda i: (0, i)),
        compiler_params=pltpu.CompilerParams(
            dimension_semantics=("parallel",)),               # shard batch over v7x's 2 TCs
    )(x_aug, params.w1t, params.w2t, params.w3t)
    return out


# ---------------------------------------------------------------------------
# Forward wrappers (PyTorch semantics) + references
# ---------------------------------------------------------------------------
def _forward_batch_xla(raw, states):
    """Pure-JAX f32 reference / small-batch fallback on the ORIGINAL parameters."""
    w1, b1, w2, b2, w3, b3 = raw
    x = states.astype(jnp.float32)
    h1 = jnp.maximum(x @ w1 + b1, 0.0)
    h2 = jax.nn.sigmoid(h1 @ w2 + b2)
    return jnp.clip(h2 @ w3 + b3, 0.001, 1.0)


def _forward_batch_bf16ref(raw, states):
    """Reference mirroring the kernel's bf16-operand / f32-accumulate matmuls."""
    w1, b1, w2, b2, w3, b3 = raw
    bfr = lambda a: a.astype(jnp.bfloat16).astype(jnp.float32)
    x = bfr(states)
    h1 = jnp.maximum(x @ bfr(w1) + bfr(b1), 0.0)
    h2 = jax.nn.sigmoid(bfr(h1) @ bfr(w2) + bfr(b2))
    return jnp.clip(bfr(h2) @ bfr(w3) + bfr(b3), 0.001, 1.0)


def actor_forward_batch(params: ActorParams, states):
    """states: (B, num_inputs) -> (means, stds), each (B,). Matches Actor.forward per row."""
    states = jnp.asarray(states, jnp.float32)
    B = states.shape[0]
    if B < MIN_PALLAS_BATCH:
        # Per-step RL inference regime: kernel launch + padding would dominate -> exact XLA path.
        out = _forward_batch_xla(params.raw, states)
        return out[:, 0], out[:, 1]
    out = _actor_mlp_pallas(params, states)
    # Feature-major output: each head is a contiguous lane row -> no strided gather.
    return out[0, :B], out[1, :B]


def actor_forward(params: ActorParams, state):
    """Unbatched PyTorch semantics: mean, stds = model(state) then clamp; returns Normal params.
    # TODO(synk): Normal(mean, std) sampling / log_prob is a host-side distribution, not a kernel op.
    """
    means, stds = actor_forward_batch(params, jnp.reshape(state, (1, -1)))
    return means[0], stds[0]


# ---------------------------------------------------------------------------
if __name__ == "__main__":
    num_inputs, num_actions, hidden_size = 8, 2, 64
    batch = 256  # -> two 128-lane tiles: exercises the grid and the "parallel" batch axis

    key = jax.random.PRNGKey(0)
    pkey, skey, s1key = jax.random.split(key, 3)
    raw = init_actor_params(pkey, num_inputs, num_actions, hidden_size)
    params = build_actor_params(raw, num_inputs, num_actions, hidden_size)

    # --- batched Pallas path ---
    states = jax.random.normal(skey, (batch, num_inputs), dtype=jnp.float32)
    means, stds = actor_forward_batch(params, states)
    means = jax.block_until_ready(means)
    stds = jax.block_until_ready(stds)

    # (a) tight vs a reference using the same bf16-operand matmuls
    ref_bf = _forward_batch_bf16ref(raw, states)
    np.testing.assert_allclose(np.asarray(means), np.asarray(ref_bf[:, 0]), rtol=5e-3, atol=5e-3)
    np.testing.assert_allclose(np.asarray(stds), np.asarray(ref_bf[:, 1]), rtol=5e-3, atol=5e-3)
    # (b) loose vs the full-f32 reference (bf16 MXU operands => relaxed tolerance)
    ref_f32 = _forward_batch_xla(raw, states)
    np.testing.assert_allclose(np.asarray(means), np.asarray(ref_f32[:, 0]), rtol=5e-2, atol=5e-2)
    np.testing.assert_allclose(np.asarray(stds), np.asarray(ref_f32[:, 1]), rtol=5e-2, atol=5e-2)
    assert float(np.min(means)) >= 0.001 and float(np.max(means)) <= 1.0
    assert float(np.min(stds)) >= 0.001 and float(np.max(stds)) <= 1.0

    # --- unbatched path (exact Actor.forward semantics; takes the small-batch XLA fast path) ---
    state = jax.random.normal(s1key, (num_inputs,), dtype=jnp.float32)
    mean, std = actor_forward(params, state)
    mean = jax.block_until_ready(mean)
    std = jax.block_until_ready(std)
    ref1 = _forward_batch_xla(raw, state.reshape(1, -1))
    np.testing.assert_allclose(float(mean), float(ref1[0, 0]), rtol=1e-5, atol=1e-5)
    np.testing.assert_allclose(float(std), float(ref1[0, 1]), rtol=1e-5, atol=1e-5)

    print("KERNEL_OK")
</pallas_src>

<mosaic_0001>
module attributes {stable_mosaic.version = 11 : i64} {
  func.func @_actor_mlp_kernel(%arg0: i32, %arg1: memref<16x128xbf16, #tpu.memory_space<vmem>>, %arg2: memref<128x16xbf16, #tpu.memory_space<vmem>>, %arg3: memref<128x128xbf16, #tpu.memory_space<vmem>>, %arg4: memref<8x128xbf16, #tpu.memory_space<vmem>>, %arg5: memref<8x128xf32, #tpu.memory_space<vmem>>) attributes {dimension_semantics = [#tpu.dimension_semantics<parallel>], iteration_bounds = array<i64: 2>, scalar_prefetch = 0 : i64, scratch_operands = 0 : i64, tpu.core_type = #tpu.core_type<tc>, window_params = [{transform_indices = @transform_0, window_bounds = array<i64: 16, 128>}, {pipeline_mode = #tpu.pipeline_mode<synchronous>, transform_indices = @transform_1, window_bounds = array<i64: 128, 16>}, {pipeline_mode = #tpu.pipeline_mode<synchronous>, transform_indices = @transform_2, window_bounds = array<i64: 128, 128>}, {pipeline_mode = #tpu.pipeline_mode<synchronous>, transform_indices = @transform_3, window_bounds = array<i64: 8, 128>}, {transform_indices = @transform_4, window_bounds = array<i64: 8, 128>}]} {
    %c0 = arith.constant 0 : index
    %c0_0 = arith.constant 0 : index
    %0 = vector.load %arg1[%c0, %c0_0] : memref<16x128xbf16, #tpu.memory_space<vmem>>, vector<16x128xbf16>
    %c0_1 = arith.constant 0 : index
    %c0_2 = arith.constant 0 : index
    %1 = vector.load %arg2[%c0_1, %c0_2] : memref<128x16xbf16, #tpu.memory_space<vmem>>, vector<128x16xbf16>
    %cst = arith.constant dense<0.000000e+00> : vector<128x128xf32>
    %2 = tpu.matmul %1, %0, %cst {dimension_numbers = #tpu.dot_dimension_numbers<[1], [0], [0], [1], [0, 0, 1, 1], [], []>} : vector<128x16xbf16>, vector<16x128xbf16>, vector<128x128xf32> -> vector<128x128xf32>
    %cst_3 = arith.constant 0.000000e+00 : f32
    %3 = vector.broadcast %cst_3 : f32 to vector<128x128xf32>
    %4 = arith.maximumf %2, %3 : vector<128x128xf32>
    %5 = arith.truncf %4 : vector<128x128xf32> to vector<128x128xbf16>
    %c0_4 = arith.constant 0 : index
    %c0_5 = arith.constant 0 : index
    %6 = vector.load %arg3[%c0_4, %c0_5] : memref<128x128xbf16, #tpu.memory_space<vmem>>, vector<128x128xbf16>
    %cst_6 = arith.constant dense<0.000000e+00> : vector<128x128xf32>
    %7 = tpu.matmul %6, %5, %cst_6 {dimension_numbers = #tpu.dot_dimension_numbers<[1], [0], [0], [1], [0, 0, 1, 1], [], []>} : vector<128x128xbf16>, vector<128x128xbf16>, vector<128x128xf32> -> vector<128x128xf32>
    %8 = arith.negf %7 : vector<128x128xf32>
    %9 = math.exp %8 : vector<128x128xf32>
    %cst_7 = arith.constant 1.000000e+00 : f32
    %10 = vector.broadcast %cst_7 : f32 to vector<128x128xf32>
    %11 = arith.addf %10, %9 : vector<128x128xf32>
    %12 = arith.divf %10, %11 : vector<128x128xf32>
    %13 = arith.truncf %12 : vector<128x128xf32> to vector<128x128xbf16>
    %c0_8 = arith.constant 0 : index
    %c0_9 = arith.constant 0 : index
    %14 = vector.load %arg4[%c0_8, %c0_9] : memref<8x128xbf16, #tpu.memory_space<vmem>>, vector<8x128xbf16>
    %cst_10 = arith.constant dense<0.000000e+00> : vector<8x128xf32>
    %15 = tpu.matmul %14, %13, %cst_10 {dimension_numbers = #tpu.dot_dimension_numbers<[1], [0], [0], [1], [0, 0, 1, 1], [], []>} : vector<8x128xbf16>, vector<128x128xbf16>, vector<8x128xf32> -> vector<8x128xf32>
    %cst_11 = arith.constant 1.000000e-03 : f32
    %cst_12 = arith.constant 1.000000e+00 : f32
    %16 = vector.broadcast %cst_11 : f32 to vector<8x128xf32>
    %17 = arith.maximumf %16, %15 : vector<8x128xf32>
    %18 = vector.broadcast %cst_12 : f32 to vector<8x128xf32>
    %19 = arith.minimumf %18, %17 : vector<8x128xf32>
    %c0_13 = arith.constant 0 : index
    %c0_14 = arith.constant 0 : index
    %20 = vector.load %arg5[%c0_13, %c0_14] : memref<8x128xf32, #tpu.memory_space<vmem>>, vector<8x128xf32>
    tpu.vector_store %arg5[%c0_13, %c0_14], %19 {strides = array<i32>} : memref<8x128xf32, #tpu.memory_space<vmem>>, vector<8x128xf32>,
    return
  }
  func.func @transform_0(%arg0: i32) -> (i32, i32) {
    %c0_i32 = arith.constant 0 : i32
    %c0_i32_0 = arith.constant 0 : i32
    return %c0_i32, %arg0 : i32, i32
  }
  func.func @transform_1(%arg0: i32) -> (i32, i32) {
    %c0_i32 = arith.constant 0 : i32
    %c0_i32_0 = arith.constant 0 : i32
    %c0_i32_1 = arith.constant 0 : i32
    return %c0_i32, %c0_i32_0 : i32, i32
  }
  func.func @transform_2(%arg0: i32) -> (i32, i32) {
    %c0_i32 = arith.constant 0 : i32
    %c0_i32_0 = arith.constant 0 : i32
    %c0_i32_1 = arith.constant 0 : i32
    return %c0_i32, %c0_i32_0 : i32, i32
  }
  func.func @transform_3(%arg0: i32) -> (i32, i32) {
    %c0_i32 = arith.constant 0 : i32
    %c0_i32_0 = arith.constant 0 : i32
    %c0_i32_1 = arith.constant 0 : i32
    return %c0_i32, %c0_i32_0 : i32, i32
  }
  func.func @transform_4(%arg0: i32) -> (i32, i32) {
    %c0_i32 = arith.constant 0 : i32
    %c0_i32_0 = arith.constant 0 : i32
    return %c0_i32, %arg0 : i32, i32
  }
}

</mosaic_0001>

<bundles_post_ra>
// kernel: tpu_custom_call.1
= control target key start
LH: loop header
LB: loop body
LE: loop exit
PB: predicated region body
PF: predicated region fallthrough
CT: control target
= control target key end

     0   :  { %9 = vsyncpa [#allocation3], 0  ;;  %s1472_s0 = inlined_call_operand.hbm [shape: bf16[16,256], index: 0, kind: input, shape index: {}]   ;;  %s1473_s1 = inlined_call_operand.vmem [shape: bf16[128,16], index: 1, kind: input, shape index: {}]   ;;  %s1474_s2 = inlined_call_operand.vmem [shape: bf16[128,128], index: 2, kind: input, shape index: {}]   ;;  %s1475_s3 = inlined_call_operand.vmem [shape: bf16[8,128], index: 3, kind: input, shape index: {}]   ;;  %s1476_s4 = inlined_call_operand.hbm [shape: f32[8,256], index: 4, kind: output, shape index: {}]  }
   0x1   :  { %11 = vsyncpa [#allocation3 + $0x1], 0 }
   0x2   :  { %12 = vsyncpa [#allocation4], 0 }
   0x3   :  { %14 = vsyncpa [#allocation4 + $0x1], 0  ;;  %s1238_s15 = smov 0   ;;  %s1240_s16 = smov 0  }
   0x4   :  { %s1242_s17 = smov 0   ;;  %s1244_s18 = smov 0  }
   0x5 LB: > { %s1259_s19 = sadd.s32 4294967295, %s1204_s18   ;;  %s819_s20 = sadd.s32 4294967294, %s1204_s18   ;;  %s1204_s18 = sphi %s1244_s18, %s1490_s18   ;;  %s1200_s17 = sphi %s1242_s17, %s1489_s17   ;;  %s1196_s16 = sphi %s1240_s16, %s1488_s16   ;;  %s1192_s15 = sphi %s1238_s15, %s1487_s15  }
   0x6   : > { %s1263_s21 = sadd.s32 1, %s1204_s18   ;;  %s27_s22 = sadd.s32 1, %s1200_s17 }
   0x7   : > { %s24_s23 = ssub.s32 %s1204_s18, %s1263_s21  ;;  %p34_p0 = scmp.ne.s32.totalorder %s1200_s17, %s1196_s16 }
   0x8   : > { %p25_p1 = scmp.eq.s32.totalorder %s24_s23, 0  ;;  %p35_p2 = scmp.eq.s32.totalorder %s1204_s18, 0 }
   0x9   : > { %p40_p3 = scmp.ne.s32.totalorder %s1196_s16, %s1192_s15  ;;  %p41_p4 = scmp.eq.s32.totalorder %s1259_s19, 0 }
   0xa   : > { %s1275_s24 = scalar_select %p25_p1, %s1200_s17, %s27_s22  }
   0xb   : > { %p1277_p5 = por %p35_p2, %p34_p0  ;;  %p1281_p6 = por %p41_p4, %p40_p3 }
   0xc   : > { %p127_p7 = scmp.eq.s32.totalorder %s1259_s19, 1  ;;  %p133_p8 = scmp.eq.s32.totalorder %s819_s20, 1 }
   0xd   : > { %p988_p10 = scmp.lt.s32.totalorder %s1204_s18, 2  ;;  %s162_s29 = sand.u32 1, %s1200_s17  }
   0xe   : > { %p1288_p11 = por %p127_p7, %p34_p0  ;;  %p1292_p12 = por %p133_p8, %p40_p3 }
   0xf   : > { %s823_s30 = sshll.u32 %s1204_s18, 6  ;;  %s822_s5 = sshll.u32 %s162_s29, 3 }
  0x10   : > { %s1480_s27 = scalar_select %p1288_p11, 1, 0 }
  0x11   : > { %s1481_s28 = scalar_select %p1292_p12, 1, 0 }
  0x12   : > { %s1301_s8 = scalar_lea.hbm %s1472_s0, %s823_s30  ;;  %s166_s9 = scalar_lea.vmem [#allocation2], %s822_s5 }
  0x13   : > { %s172_s10 = sshll.u32 %s166_s9, 4  ;;  %p1305_p13 = pnand %p988_p10, %p1277_p5  ;;  %s1309_s10 = int_to_ptr.vmem [resolvable:$true] %s172_s10 }
  0x14   : > { %s1312_s12 = scalar_lea.sflag [#allocation3], %s162_s29  ;;  %s1108_s13 = scalar_lea.hbm %s1301_s8, 128 }
  0x15   : > { %p1109_p1 = scmp.ne.s32.totalorder %s1301_s8, %s1108_s13  ;;  %p1110_p2 = pneg %p1305_p13 }
  0x16   : > { %s1113_s22 = scalar_lea.hbm %s1472_s0, 256  ;;  %p1114_p5 = scmp.lt.u32.totalorder %s1301_s8, %s1472_s0 }
  0x17   : > { %p1111_p3 = pnand %p1110_p2, %p1109_p1  ;;  %p1115_p7 = scmp.lt.u32.totalorder %s1113_s22, %s1108_s13 }
  0x18   : > { %p1117_p10 = scmp.lt.u32.totalorder %s1108_s13, %s1301_s8 }
  0x19   : > { %p1112_p4 = pneg %p1111_p3  ;;  %p1116_p8 = por %p1115_p7, %p1114_p5 }
  0x1b   : > { %p1118_p9 = por %p1117_p10, %p1116_p8 }
  0x1d   : > { %p1119_p0 = pnand %p1118_p9, %p1112_p4 }
  0x1f   : > { %1122 = shalt.err (!%p1119_p0)
}
  0x20   : > { %s1123_s29 = scalar_lea.vmem %s1309_s10, 128  ;;  %s1206_s30 = smov [#allocation2]  }
  0x21   : > { %p1124_p1 = scmp.ne.s32.totalorder %s1309_s10, %s1123_s29  ;;  %s1128_s5 = sshll.u32 %s1206_s30, 4  ;;  %s1129_s5 = int_to_ptr.vmem [resolvable:$false] %s1128_s5 }
  0x22   : > { %s1130_s6 = scalar_lea.vmem %s1129_s5, 256  ;;  %p1131_p11 = scmp.lt.s32.totalorder %s1309_s10, %s1129_s5 }
  0x23   : > { %p1126_p3 = pnand %p1124_p1, %p1110_p2  ;;  %p1132_p5 = scmp.lt.s32.totalorder %s1130_s6, %s1123_s29 }
  0x25   : > { %p1127_p12 = pneg %p1126_p3  ;;  %p1133_p7 = por %p1132_p5, %p1131_p11 }
  0x27   : > { %p1134_p8 = pnand %p1133_p7, %p1127_p12 }
  0x29   : > { %1137 = shalt.err (!%p1134_p8)
}
  0x2a   : > { %s1207_s7 = smov 128   ;;  %s1208_s9 = smov 64  }
  0x2b   : > { %s1209_s13 = smov 4   ;;  %p180_p9 = scmp.lt.s32.totalorder %s1204_s18, 3 }
  0x2c   : > { %983 = dma.hbm_to_vmem [thread:$0]  (!%p1305_p13), %s1301_s8, 128, %s1309_s10, %s1312_s12, %s1207_s7, %s1208_s9, %s1209_s13  }
  0x2d   : > { %p1483_p0 = scmp.ge.s32.totalorder %s1204_s18, 1 }
  0x2f   : > { %p181_p2 = pnand %p1483_p0, %p180_p9 }
  0x30   : > { %s1344_s14 = sand.u32 (!%p181_p2), 1, %s1196_s16  }
  0x31   : > { %184 = sbr.rel (%p181_p2) target bundleno = 818 (0x332), region = 36  ;;  %s825_s20 = sshll.u32 (!%p181_p2), %s1344_s14, 3 }
  0x32   : > { %s187_s22 = scalar_lea.sflag (!%p181_p2), [#allocation3], %s1344_s14  ;;  %s190_s23 = scalar_lea.vmem (!%p181_p2), [#allocation2], %s825_s20 }
  0x38   : > { %1183 = dma.done.wait (%p1281_p6), %s187_s22, 128  }
  0x39   : > { %1185 = vsyncadd (%p1281_p6), %s187_s22, 4294967168  ;;  %v1027_v0 = vld [vmem:[%s190_s23] sm:$0xff]   ;;  %vm280_vm0 = vcmask 130048   ;;  %v1030_v3 = vld [vmem:[%s1473_s1 + $0x10] sm:$0xff]   ;;  %v1210_v57 = vmov 0.0   ;;  %vm1211_vm1 = vmmov 0  }
  0x3a   : > { %v1028_v1 = vld [vmem:[%s1473_s1] sm:$0xff]   ;;  %906 = vmatprep.subr.bf16.mxu0 %v1027_v0  ;;  %v1029_v2 = vld [vmem:[%s1473_s1 + $0x8] sm:$0xff]   ;;  %v1031_v4 = vld [vmem:[%s1473_s1 + $0x18] sm:$0xff]   ;;  %s869_s25 = sshll.u32 %s1259_s19, 7  ;;  %s214_s29 = scalar_lea.vmem [#allocation5], %s825_s20 }
  0x3b   : > { %907 = vmatpush3.bf16.msra.mxu0 %v1027_v0  ;;  %908 = vmatprep.mubr.msk.bf16.mxu0 %vm280_vm0, %v1028_v1  ;;  %v1032_v5 = vld [vmem:[%s1473_s1 + $0x20] sm:$0xff]   ;;  %v1033_v6 = vld [vmem:[%s1473_s1 + $0x28] sm:$0xff]   ;;  %v1034_v7 = vld [vmem:[%s1473_s1 + $0x30] sm:$0xff]   ;;  %s749_s26 = sshll.u32 %s214_s29, 4  ;;  %s1428_s6 = scalar_lea.hbm %s1476_s4, %s869_s25  ;;  %s1430_s26 = int_to_ptr.vmem [resolvable:$true] %s749_s26 }
  0x3c   : > { %v1035_v8 = vld [vmem:[%s1473_s1 + $0x38] sm:$0xff]   ;;  %v1036_v9 = vld [vmem:[%s1474_s2] sm:$0xff]   ;;  %v1037_v50 = vld [vmem:[%s1474_s2 + $0x8] sm:$0xff]   ;;  %956 = vmatprep.subr.bf16.mxu0 %v1210_v57  ;;  %s736_s19 = scalar_lea.sflag [#allocation4], %s1344_s14  ;;  %s1138_s7 = scalar_lea.vmem %s1430_s26, 128 }
  0x3d   : > { %940 = vmatprep.mubr.bf16.mxu1 %v1036_v9  ;;  %v1038_v51 = vld [vmem:[%s1474_s2 + $0x10] sm:$0xff]   ;;  %v1039_v52 = vld [vmem:[%s1474_s2 + $0x18] sm:$0xff]   ;;  %v1040_v53 = vld [vmem:[%s1474_s2 + $0x20] sm:$0xff]   ;;  %p1139_p6 = scmp.ne.s32.totalorder %s1430_s26, %s1138_s7  ;;  %p1484_p11 = scmp.ne.s32.totalorder %s1480_s27, 0 }
  0x3e   : > { %909 = vmatmul.mubr.msk.bf16.vlgmr.msra.gmra.mrb[0].mxu0 %vm280_vm0, %v1029_v2  ;;  %v1041_v54 = vld [vmem:[%s1474_s2 + $0x28] sm:$0xff]   ;;  %v1042_v55 = vld [vmem:[%s1474_s2 + $0x30] sm:$0xff]   ;;  %v1043_v56 = vld [vmem:[%s1474_s2 + $0x38] sm:$0xff]   ;;  %s1212_s20 = smov [#allocation5]  }
  0x3f   : > { %912 = vmatprep.mubr.msk.bf16.mxu0 %vm280_vm0, %v1030_v3  ;;  %p1140_p12 = pnand %p1139_p6, %p1484_p11  ;;  %s1142_s9 = sshll.u32 %s1212_s20, 4  ;;  %s1143_s9 = int_to_ptr.vmem [resolvable:$false] %s1142_s9 }
  0x40   : > { %s1144_s13 = scalar_lea.vmem %s1143_s9, 256  ;;  %p1145_p4 = scmp.lt.s32.totalorder %s1430_s26, %s1143_s9 }
  0x41   : > { %p1141_p13 = pneg %p1140_p12  ;;  %p1146_p10 = scmp.lt.s32.totalorder %s1144_s13, %s1138_s7 }
  0x43   : > { %p1147_p1 = por %p1146_p10, %p1145_p4 }
  0x45   : > { %p1148_p3 = pnand %p1147_p1, %p1141_p13 }
  0x46   : > { %913 = vmatmul.mubr.msk.bf16.gmra.mrb[4].mxu0 %vm280_vm0, %v1031_v4 }
  0x47   : > { %916 = vmatprep.mubr.msk.bf16.mxu0 %vm280_vm0, %v1032_v5 }
  0x4e   : > { %917 = vmatmul.mubr.msk.bf16.gmra.mrb[8].mxu0 %vm280_vm0, %v1033_v6 }
  0x4f   : > { %920 = vmatprep.mubr.msk.bf16.mxu0 %vm280_vm0, %v1034_v7 }
  0x56   : > { %921 = vmatmul.mubr.msk.bf16.gmra.mrb[12].mxu0 %vm280_vm0, %v1035_v8 }
  0x57   : > { %972 = vmatprep.mubr.msk.bf16.mxu0 %vm1211_vm1, %v1210_v57 }
 0x111   : > { %v910_v10 = vpop.f32.mrb[0].mxu0 }
 0x112   : > { %v339_v11 = vpop.f32.mrb[1].mxu0  ;;  %v404_v13 = vmax.f32 %v910_v10, 0.0 }
 0x113   : > { %v911_v12 = vpop.f32.mrb[2].mxu0  ;;  %v402_v16 = vmax.f32 %v339_v11, 0.0 }
 0x114   : > { %v405_v14 = vmax.f32 %v911_v12, 0.0  ;;  %v342_v15 = vpop.f32.mrb[3].mxu0 }
 0x115   : > { %v403_v17 = vmax.f32 %v342_v15, 0.0 }
 0x116   : > { %v419_v18 = vpack.c.bf16 %v405_v14, %v404_v13 }
 0x117   : > { %v418_v19 = vpack.c.bf16 %v403_v17, %v402_v16 }
 0x119   : > { %v914_v20 = vpop.f32.mrb[4].mxu0  ;;  %924 = vmatprep.subr.bf16.mxu1 %v418_v19 }
 0x11a   : > { %v355_v21 = vpop.f32.mrb[5].mxu0  ;;  %925 = vmatpush3.bf16.msra.mxu1 %v418_v19  ;;  %v408_v23 = vmax.f32 %v914_v20, 0.0 }
 0x11b   : > { %v915_v22 = vpop.f32.mrb[6].mxu0  ;;  %926 = vmatprep.subr.bf16.mxu1 %v419_v18  ;;  %v406_v26 = vmax.f32 %v355_v21, 0.0 }
 0x11c   : > { %v409_v24 = vmax.f32 %v915_v22, 0.0  ;;  %v358_v25 = vpop.f32.mrb[7].mxu0 }
 0x11d   : > { %v407_v27 = vmax.f32 %v358_v25, 0.0 }
 0x11e   : > { %v421_v28 = vpack.c.bf16 %v409_v24, %v408_v23  ;;  %927 = vmatpush3.bf16.msra.mxu1 %v419_v18 }
 0x11f   : > { %v420_v29 = vpack.c.bf16 %v407_v27, %v406_v26 }
 0x121   : > { %v918_v30 = vpop.f32.mrb[8].mxu0  ;;  %928 = vmatprep.subr.bf16.mxu1 %v420_v29 }
 0x122   : > { %v371_v31 = vpop.f32.mrb[9].mxu0  ;;  %929 = vmatpush3.bf16.msra.mxu1 %v420_v29  ;;  %v412_v33 = vmax.f32 %v918_v30, 0.0 }
 0x123   : > { %v919_v32 = vpop.f32.mrb[10].mxu0  ;;  %930 = vmatprep.subr.bf16.mxu1 %v421_v28  ;;  %v410_v36 = vmax.f32 %v371_v31, 0.0 }
 0x124   : > { %v413_v34 = vmax.f32 %v919_v32, 0.0  ;;  %v374_v35 = vpop.f32.mrb[11].mxu0 }
 0x125   : > { %v411_v37 = vmax.f32 %v374_v35, 0.0 }
 0x126   : > { %v423_v38 = vpack.c.bf16 %v413_v34, %v412_v33  ;;  %931 = vmatpush3.bf16.msra.mxu1 %v421_v28 }
 0x127   : > { %v422_v39 = vpack.c.bf16 %v411_v37, %v410_v36 }
 0x129   : > { %v922_v40 = vpop.f32.mrb[12].mxu0  ;;  %932 = vmatprep.subr.bf16.mxu1 %v422_v39 }
 0x12a   : > { %v387_v41 = vpop.f32.mrb[13].mxu0  ;;  %933 = vmatpush3.bf16.msra.mxu1 %v422_v39  ;;  %v416_v43 = vmax.f32 %v922_v40, 0.0 }
 0x12b   : > { %v923_v42 = vpop.f32.mrb[14].mxu0  ;;  %934 = vmatprep.subr.bf16.mxu1 %v423_v38  ;;  %v414_v46 = vmax.f32 %v387_v41, 0.0 }
 0x12c   : > { %v417_v44 = vmax.f32 %v923_v42, 0.0  ;;  %v390_v45 = vpop.f32.mrb[15].mxu0 }
 0x12d   : > { %v415_v47 = vmax.f32 %v390_v45, 0.0 }
 0x12e   : > { %v425_v48 = vpack.c.bf16 %v417_v44, %v416_v43  ;;  %935 = vmatpush3.bf16.msra.mxu1 %v423_v38 }
 0x12f   : > { %v424_v49 = vpack.c.bf16 %v415_v47, %v414_v46 }
 0x131   : > { %936 = vmatprep.subr.bf16.mxu1 %v424_v49 }
 0x132   : > { %937 = vmatpush3.bf16.msra.mxu1 %v424_v49 }
 0x133   : > { %938 = vmatprep.subr.bf16.mxu1 %v425_v48 }
 0x136   : > { %939 = vmatpush3.bf16.msra.mxu1 %v425_v48 }
 0x139   : > { %941 = vmatmul.mubr.bf16.vlgmr.msra.gmra.mrb[0].mxu1 %v1037_v50 }
 0x13a   : > { %944 = vmatprep.mubr.bf16.mxu1 %v1038_v51 }
 0x141   : > { %945 = vmatmul.mubr.bf16.gmra.mrb[4].mxu1 %v1039_v52 }
 0x142   : > { %948 = vmatprep.mubr.bf16.mxu1 %v1040_v53 }
 0x149   : > { %949 = vmatmul.mubr.bf16.gmra.mrb[8].mxu1 %v1041_v54 }
 0x14a   : > { %952 = vmatprep.mubr.bf16.mxu1 %v1042_v55 }
 0x151   : > { %953 = vmatmul.mubr.bf16.gmra.mrb[12].mxu1 %v1043_v56 }
 0x20c   : > { %v942_v58 = vpop.f32.mrb[0].mxu1 }
 0x20d   : > { %v854_v59 = vmul.f32 -1.442695, %v942_v58  ;;  %v524_v60 = vpop.f32.mrb[1].mxu1 }
 0x20e   : > { %v852_v61 = vmul.f32 -1.442695, %v524_v60  ;;  %v943_v62 = vpop.f32.mrb[2].mxu1 }
 0x20f   : > { %1044 = vpow2.f32 %v854_v59  ;;  %v855_v63 = vmul.f32 -1.442695, %v943_v62  ;;  %v527_v0 = vpop.f32.mrb[3].mxu1 }
 0x210   : > { %1046 = vpow2.f32 %v852_v61  ;;  %v853_v1 = vmul.f32 -1.442695, %v527_v0 }
 0x211   : > { %1048 = vpow2.f32 %v855_v63 }
 0x212   : > { %1050 = vpow2.f32 %v853_v1 }
 0x214   : > { %v946_v2 = vpop.f32.mrb[4].mxu1 }
 0x215   : > { %v858_v3 = vmul.f32 -1.442695, %v946_v2  ;;  %v540_v4 = vpop.f32.mrb[5].mxu1 }
 0x216   : > { %v856_v5 = vmul.f32 -1.442695, %v540_v4  ;;  %v947_v6 = vpop.f32.mrb[6].mxu1 }
 0x217   : > { %1052 = vpow2.f32 %v858_v3  ;;  %v859_v7 = vmul.f32 -1.442695, %v947_v6  ;;  %v543_v8 = vpop.f32.mrb[7].mxu1 }
 0x218   : > { %1054 = vpow2.f32 %v856_v5  ;;  %v857_v9 = vmul.f32 -1.442695, %v543_v8 }
 0x219   : > { %v1045_v10 = vpop.eup %1044  ;;  %1056 = vpow2.f32 %v859_v7 }
 0x21a   : > { %v1047_v11 = vpop.eup %1046  ;;  %v637_v12 = vadd.f32 1.0, %v1045_v10  ;;  %1058 = vpow2.f32 %v857_v9 }
 0x21b   : > { %v1049_v13 = vpop.eup %1048  ;;  %v635_v14 = vadd.f32 1.0, %v1047_v11 }
 0x21c   : > { %v1051_v15 = vpop.eup %1050  ;;  %1060 = vrcp.f32 %v637_v12  ;;  %v638_v16 = vadd.f32 1.0, %v1049_v13  ;;  %v950_v17 = vpop.f32.mrb[8].mxu1 }
 0x21d   : > { %1062 = vrcp.f32 %v635_v14  ;;  %v636_v18 = vadd.f32 1.0, %v1051_v15  ;;  %v862_v19 = vmul.f32 -1.442695, %v950_v17  ;;  %v556_v20 = vpop.f32.mrb[9].mxu1 }
 0x21e   : > { %1064 = vrcp.f32 %v638_v16  ;;  %v860_v21 = vmul.f32 -1.442695, %v556_v20  ;;  %v951_v22 = vpop.f32.mrb[10].mxu1 }
 0x21f   : > { %1066 = vrcp.f32 %v636_v18  ;;  %v863_v23 = vmul.f32 -1.442695, %v951_v22  ;;  %v559_v24 = vpop.f32.mrb[11].mxu1 }
 0x220   : > { %1068 = vpow2.f32 %v862_v19  ;;  %v861_v25 = vmul.f32 -1.442695, %v559_v24  ;;  %v691_v19 = vld [vmem:[%s1475_s3] sm:$0xf] }
 0x221   : > { %v1053_v26 = vpop.eup %1052  ;;  %1070 = vpow2.f32 %v860_v21 }
 0x222   : > { %v1055_v27 = vpop.eup %1054  ;;  %v641_v28 = vadd.f32 1.0, %v1053_v26  ;;  %1072 = vpow2.f32 %v863_v23 }
 0x223   : > { %v1057_v29 = vpop.eup %1056  ;;  %v639_v30 = vadd.f32 1.0, %v1055_v27  ;;  %1074 = vpow2.f32 %v861_v25 }
 0x224   : > { %v1059_v31 = vpop.eup %1058  ;;  %1076 = vrcp.f32 %v641_v28  ;;  %v642_v32 = vadd.f32 1.0, %v1057_v29  ;;  %v954_v33 = vpop.f32.mrb[12].mxu1 }
 0x225   : > { %1078 = vrcp.f32 %v639_v30  ;;  %v640_v34 = vadd.f32 1.0, %v1059_v31  ;;  %v866_v35 = vmul.f32 -1.442695, %v954_v33  ;;  %v572_v36 = vpop.f32.mrb[13].mxu1 }
 0x226   : > { %v1061_v37 = vpop.eup %1060  ;;  %1080 = vrcp.f32 %v642_v32  ;;  %v864_v38 = vmul.f32 -1.442695, %v572_v36  ;;  %v955_v39 = vpop.f32.mrb[14].mxu1 }
 0x227   : > { %v1063_v40 = vpop.eup %1062  ;;  %1082 = vrcp.f32 %v640_v34  ;;  %v867_v41 = vmul.f32 -1.442695, %v955_v39  ;;  %v575_v42 = vpop.f32.mrb[15].mxu1 }
 0x228   : > { %v1065_v43 = vpop.eup %1064  ;;  %1084 = vpow2.f32 %v866_v35  ;;  %v865_v44 = vmul.f32 -1.442695, %v575_v42 }
 0x229   : > { %v1067_v45 = vpop.eup %1066  ;;  %1086 = vpow2.f32 %v864_v38  ;;  %v684_v46 = vpack.c.bf16 %v1065_v43, %v1061_v37 }
 0x22a   : > { %v1069_v47 = vpop.eup %1068  ;;  %1088 = vpow2.f32 %v867_v41  ;;  %v683_v48 = vpack.c.bf16 %v1067_v45, %v1063_v40 }
 0x22b   : > { %v1071_v49 = vpop.eup %1070  ;;  %v645_v50 = vadd.f32 1.0, %v1069_v47  ;;  %1090 = vpow2.f32 %v865_v44 }
 0x22c   : > { %v1073_v51 = vpop.eup %1072  ;;  %v643_v52 = vadd.f32 1.0, %v1071_v49  ;;  %957 = vmatpush3.bf16.msra.mxu0 %v683_v48 }
 0x22d   : > { %v1075_v53 = vpop.eup %1074  ;;  %1092 = vrcp.f32 %v645_v50  ;;  %v646_v54 = vadd.f32 1.0, %v1073_v51  ;;  %958 = vmatprep.subr.bf16.mxu0 %v1210_v57 }
 0x22e   : > { %v1077_v55 = vpop.eup %1076  ;;  %1094 = vrcp.f32 %v643_v52  ;;  %v644_v56 = vadd.f32 1.0, %v1075_v53 }
 0x22f   : > { %v1079_v58 = vpop.eup %1078  ;;  %1096 = vrcp.f32 %v646_v54 }
 0x230   : > { %v1081_v59 = vpop.eup %1080  ;;  %1098 = vrcp.f32 %v644_v56  ;;  %959 = vmatpush3.bf16.msra.mxu0 %v684_v46 }
 0x231   : > { %v1083_v60 = vpop.eup %1082  ;;  %960 = vmatprep.subr.bf16.mxu0 %v1210_v57  ;;  %v686_v61 = vpack.c.bf16 %v1081_v59, %v1077_v55 }
 0x232   : > { %v1085_v62 = vpop.eup %1084  ;;  %v685_v63 = vpack.c.bf16 %v1083_v60, %v1079_v58 }
 0x233   : > { %v1087_v0 = vpop.eup %1086  ;;  %v649_v1 = vadd.f32 1.0, %v1085_v62 }
 0x234   : > { %v1089_v2 = vpop.eup %1088  ;;  %v647_v3 = vadd.f32 1.0, %v1087_v0  ;;  %961 = vmatpush3.bf16.msra.mxu0 %v685_v63 }
 0x235   : > { %v1091_v4 = vpop.eup %1090  ;;  %1100 = vrcp.f32 %v649_v1  ;;  %v650_v5 = vadd.f32 1.0, %v1089_v2  ;;  %962 = vmatprep.subr.bf16.mxu0 %v1210_v57 }
 0x236   : > { %1102 = vrcp.f32 %v647_v3  ;;  %v648_v6 = vadd.f32 1.0, %v1091_v4 }
 0x237   : > { %v1093_v7 = vpop.eup %1092  ;;  %1104 = vrcp.f32 %v650_v5 }
 0x238   : > { %v1095_v8 = vpop.eup %1094  ;;  %1106 = vrcp.f32 %v648_v6  ;;  %963 = vmatpush3.bf16.msra.mxu0 %v686_v61 }
 0x239   : > { %v1097_v9 = vpop.eup %1096  ;;  %964 = vmatprep.subr.bf16.mxu0 %v1210_v57 }
 0x23a   : > { %v1099_v10 = vpop.eup %1098  ;;  %v688_v11 = vpack.c.bf16 %v1097_v9, %v1093_v7 }
 0x23b   : > { %v687_v12 = vpack.c.bf16 %v1099_v10, %v1095_v8 }
 0x23d   : > { %965 = vmatpush3.bf16.msra.mxu0 %v687_v12 }
 0x23e   : > { %966 = vmatprep.subr.bf16.mxu0 %v1210_v57 }
 0x23f   : > { %v1101_v13 = vpop.eup %1100 }
 0x240   : > { %v1103_v14 = vpop.eup %1102 }
 0x241   : > { %v1105_v15 = vpop.eup %1104  ;;  %967 = vmatpush3.bf16.msra.mxu0 %v688_v11 }
 0x242   : > { %v1107_v16 = vpop.eup %1106  ;;  %968 = vmatprep.subr.bf16.mxu0 %v1210_v57  ;;  %v690_v17 = vpack.c.bf16 %v1105_v15, %v1101_v13 }
 0x243   : > { %v689_v18 = vpack.c.bf16 %v1107_v16, %v1103_v14 }
 0x245   : > { %969 = vmatpush3.bf16.msra.mxu0 %v689_v18 }
 0x246   : > { %970 = vmatprep.subr.bf16.mxu0 %v1210_v57 }
 0x249   : > { %971 = vmatpush3.bf16.msra.mxu0 %v690_v17 }
 0x24c   : > { %973 = vmatmul.mubr.bf16.vlgmr.msra.gmra.mrb[16].mxu0 %v691_v19 }
 0x31f   : > { %v726_v20 = vpop.f32.mrb[16].mxu0 }
 0x320   : > { %v732_v21 = vmax.f32 %v726_v20, 0.001  ;;  %v974_v22 = vpop.f32.mrb[17].mxu0 }
 0x321   : > { %v729_v23 = vpop.f32.mrb[18].mxu0 }
 0x322   : > { %v733_v24 = vmin.f32 %v732_v21, 1.0  ;;  %v975_v25 = vpop.f32.mrb[19].mxu0 }
 0x324   : > { %734 = vst [vmem:[%s214_s29] sm:$0xff] %v733_v24 }
 0x325   : > { %1151 = shalt.err (!%p1148_p3)
}
 0x326   : > { %s1152_s14 = scalar_lea.hbm %s1428_s6, 128  ;;  %s1156_s8 = scalar_lea.hbm %s1476_s4, 256 }
 0x327   : > { %p1153_p5 = scmp.ne.s32.totalorder %s1428_s6, %s1152_s14  ;;  %p1157_p9 = scmp.lt.u32.totalorder %s1428_s6, %s1476_s4 }
 0x328   : > { %p1158_p0 = scmp.lt.u32.totalorder %s1156_s8, %s1152_s14  ;;  %p1160_p6 = scmp.lt.u32.totalorder %s1152_s14, %s1428_s6 }
 0x329   : > { %p1154_p7 = pnand %p1153_p5, %p1484_p11 }
 0x32a   : > { %p1159_p2 = por %p1158_p0, %p1157_p9 }
 0x32b   : > { %p1155_p8 = pneg %p1154_p7 }
 0x32c   : > { %p1161_p12 = por %p1160_p6, %p1159_p2 }
 0x32e   : > { %p1162_p13 = pnand %p1161_p12, %p1155_p8 }
 0x330   : > { %1165 = shalt.err (!%p1162_p13)
}
 0x331   : > { %978 = dma.vmem_to_hbm [thread:$0]  (%p1484_p11), %s1430_s26, 128, %s1428_s6, %s736_s19  }
 0x332 PF: > { %s761_s12 = sand.u32 1, %s1192_s15   ;;  %p1485_p4 = scmp.ne.s32.totalorder %s1481_s28, 0 }
 0x333   : > { %p1486_p10 = scmp.ge.s32.totalorder %s1204_s18, 2  ;;  %s762_s25 = scalar_lea.sflag [#allocation4], %s761_s12 }
 0x335   : > { %p985_p1 = pnand %p1486_p10, %p1485_p4 }
 0x337   : > { %1187 = dma.done.wait (!%p985_p1), %s762_s25, 128  }
 0x338   : > { %1189 = vsyncadd (!%p985_p1), %s762_s25, 4294967168  ;;  %p17_p3 = scmp.ge.s32.totalorder %s1263_s21, 4   ;;  %s1487_s15 = smov %s1196_s16 }
 0x339   : > { %s1488_s16 = smov %s1200_s17  ;;  %s1489_s17 = smov %s1275_s24 }
 0x33a   : > { %s1490_s18 = smov %s1263_s21  ;;  %19 = sbr.rel (!%p17_p3) target bundleno = 5 (0x5), region = 81 }
 0x341   :  { %767 = vsyncpa [#allocation3], 1 }
 0x342   :  { %769 = vsyncpa [#allocation3 + $0x1], 1 }
 0x343   :  { %770 = vsyncpa [#allocation4], 1 }
 0x344   :  { %772 = vsyncpa [#allocation4 + $0x1], 1 }

</bundles_post_ra>
